<compile_context>
chip_gen: v7x
topology: tpu7x:2x2x1
jax: 0.10.0
libtpu: 0.0.40
codegen_flags: <defaults>
</compile_context>

<pallas_src>
import functools

import jax
import jax.numpy as jnp
from jax.experimental import pallas as pl
from jax.experimental.pallas import tpu as pltpu


def _critic_kernel(xt_ref, w1_ref, b1_ref, w2_ref, b2_ref, w3_ref, b3_ref, o_ref):
    """One batch tile, fully resident in VMEM, batch on the lane axis.

    xt_ref: (in, tm)      w1_ref: (h1, in)   b1_ref: (h1, 1)
    w2_ref: (h2, h1)      b2_ref: (h2, 1)
    w3_ref: (h2, 1)       b3_ref: (1,) in SMEM
    o_ref : (1, tm)       lane-dense output row
    """
    slope = jnp.float32(0.01)

    xt = xt_ref[...]                                     # (in, tm), already f32

    # Layer 1: h^T = W1 @ x^T + b1   (MXU, N = tile_m lane-dense)
    h = jnp.dot(w1_ref[...], xt, preferred_element_type=jnp.float32) + b1_ref[...]
    h = jnp.where(h > 0, h, slope * h)

    # Layer 2: h^T = W2 @ h^T + b2
    h = jnp.dot(w2_ref[...], h, preferred_element_type=jnp.float32) + b2_ref[...]
    h = jnp.where(h > 0, h, slope * h)

    # Layer 3 (h2 -> 1): VPU multiply + sublane reduce (no MXU), result already lane-dense.
    out = jnp.sum(h * w3_ref[...], axis=0, keepdims=True) + b3_ref[0]   # (1, tm)

    o_ref[...] = out.astype(o_ref.dtype)


@functools.partial(jax.jit, static_argnames=("tile_m",))
def critic_forward(x, params, tile_m=512):
    """x: (B, input_size) f32; params in torch layout (W: (out, in), b: (out,)) -> (B, 1) f32."""
    w1, b1, w2, b2, w3, b3 = params
    B, in_dim = x.shape
    h1 = w1.shape[0]
    h2 = w2.shape[0]

    num_tiles = pl.cdiv(B, tile_m)
    b_pad = num_tiles * tile_m
    if b_pad != B:
        x = jnp.pad(x, ((0, b_pad - B), (0, 0)))
    xt = x.T                                             # (in_dim, b_pad): batch on lanes

    # Kernel-side parameter layout (tiny; resident for the whole grid).
    b1c = b1.reshape(h1, 1)
    b2c = b2.reshape(h2, 1)
    w3c = w3.reshape(h2, 1)
    b3s = b3.reshape(1)

    vmem = pl.BlockSpec(memory_space=pltpu.MemorySpace.VMEM)
    smem = pl.BlockSpec(memory_space=pltpu.MemorySpace.SMEM)

    out = pl.pallas_call(
        _critic_kernel,
        out_shape=jax.ShapeDtypeStruct((num_tiles, 1, tile_m), jnp.float32),
        grid=(num_tiles,),
        in_specs=[
            pl.BlockSpec((in_dim, tile_m), lambda i: (0, i)),   # x^T tile (only streamed input)
            vmem,   # W1 (h1, in)
            vmem,   # b1 (h1, 1)
            vmem,   # W2 (h2, h1)
            vmem,   # b2 (h2, 1)
            vmem,   # w3 (h2, 1)
            smem,   # b3 scalar
        ],
        out_specs=pl.BlockSpec((None, 1, tile_m), lambda i: (i, 0, 0)),
        compiler_params=pltpu.CompilerParams(dimension_semantics=("parallel",)),
    )(xt, w1, b1c, w2, b2c, w3c, b3s)

    return out.reshape(b_pad, 1)[:B]


def init_linear(key, fan_in, fan_out):
    """torch.nn.Linear default init: U(-1/sqrt(fan_in), 1/sqrt(fan_in)); torch layout W:(out,in)."""
    kw, kb = jax.random.split(key)
    bound = 1.0 / jnp.sqrt(jnp.float32(fan_in))
    w = jax.random.uniform(kw, (fan_out, fan_in), jnp.float32, -bound, bound)
    b = jax.random.uniform(kb, (fan_out,), jnp.float32, -bound, bound)
    return w, b


def reference_forward(x, params):
    """Pure-JAX reference of the same MLP (torch-layout params)."""
    w1, b1, w2, b2, w3, b3 = params
    h = x @ w1.T + b1
    h = jnp.where(h > 0, h, 0.01 * h)
    h = h @ w2.T + b2
    h = jnp.where(h > 0, h, 0.01 * h)
    return h @ w3.T + b3


if __name__ == "__main__":
    # Critic(input_size=32, hidden_size=[64, 64]) -> layer sizes [32, 64, 64, 1]
    batch = 384            # not a multiple of tile_m -> exercises the padded-tail path
    input_size = 32
    hidden_size = [64, 64]
    tile_m = 256           # 2 grid steps -> both v7x TensorCores get work

    key = jax.random.PRNGKey(0)
    kx, k1, k2, k3 = jax.random.split(key, 4)

    x = jax.random.normal(kx, (batch, input_size), jnp.float32)
    w1, b1 = init_linear(k1, input_size, hidden_size[0])
    w2, b2 = init_linear(k2, hidden_size[0], hidden_size[1])
    w3, b3 = init_linear(k3, hidden_size[1], 1)
    params = (w1, b1, w2, b2, w3, b3)

    out = critic_forward(x, params, tile_m=tile_m)
    out = jax.block_until_ready(out)

    ref = reference_forward(x, params)
    assert out.shape == (batch, 1), out.shape
    max_err = float(jnp.max(jnp.abs(out - ref)))
    assert jnp.allclose(out, ref, atol=1e-4, rtol=1e-4), f"mismatch vs reference, max_err={max_err}"

    print("KERNEL_OK")
</pallas_src>

<mosaic_0001>
module attributes {stable_mosaic.version = 11 : i64} {
  func.func @_critic_kernel(%arg0: i32, %arg1: memref<32x256xf32, #tpu.memory_space<vmem>>, %arg2: memref<64x32xf32, #tpu.memory_space<vmem>>, %arg3: memref<64x1xf32, #tpu.memory_space<vmem>>, %arg4: memref<64x64xf32, #tpu.memory_space<vmem>>, %arg5: memref<64x1xf32, #tpu.memory_space<vmem>>, %arg6: memref<64x1xf32, #tpu.memory_space<vmem>>, %arg7: memref<1xf32, #tpu.memory_space<smem>>, %arg8: memref<1x1x256xf32, #tpu.memory_space<vmem>>) attributes {dimension_semantics = [#tpu.dimension_semantics<parallel>], iteration_bounds = array<i64: 2>, scalar_prefetch = 0 : i64, scratch_operands = 0 : i64, tpu.core_type = #tpu.core_type<tc>, window_params = [{transform_indices = @transform_0, window_bounds = array<i64: 32, 256>}, {pipeline_mode = #tpu.pipeline_mode<synchronous>, transform_indices = @transform_1, window_bounds = array<i64: 64, 32>}, {pipeline_mode = #tpu.pipeline_mode<synchronous>, transform_indices = @transform_2, window_bounds = array<i64: 64, 1>}, {pipeline_mode = #tpu.pipeline_mode<synchronous>, transform_indices = @transform_3, window_bounds = array<i64: 64, 64>}, {pipeline_mode = #tpu.pipeline_mode<synchronous>, transform_indices = @transform_4, window_bounds = array<i64: 64, 1>}, {pipeline_mode = #tpu.pipeline_mode<synchronous>, transform_indices = @transform_5, window_bounds = array<i64: 64, 1>}, {transform_indices = @transform_6, window_bounds = array<i64: 1>}, {transform_indices = @transform_7, window_bounds = array<i64: 1, 1, 256>}]} {
    %c0 = arith.constant 0 : index
    %c0_0 = arith.constant 0 : index
    %0 = vector.load %arg1[%c0, %c0_0] : memref<32x256xf32, #tpu.memory_space<vmem>>, vector<32x256xf32>
    %c0_1 = arith.constant 0 : index
    %c0_2 = arith.constant 0 : index
    %1 = vector.load %arg2[%c0_1, %c0_2] : memref<64x32xf32, #tpu.memory_space<vmem>>, vector<64x32xf32>
    %cst = arith.constant dense<0.000000e+00> : vector<64x256xf32>
    %2 = tpu.matmul %1, %0, %cst {dimension_numbers = #tpu.dot_dimension_numbers<[1], [0], [0], [1], [0, 0, 1, 1], [], []>} : vector<64x32xf32>, vector<32x256xf32>, vector<64x256xf32> -> vector<64x256xf32>
    %c0_3 = arith.constant 0 : index
    %c0_4 = arith.constant 0 : index
    %3 = vector.load %arg3[%c0_3, %c0_4] : memref<64x1xf32, #tpu.memory_space<vmem>>, vector<64x1xf32>
    %4 = vector.broadcast %3 : vector<64x1xf32> to vector<64x256xf32>
    %5 = arith.addf %2, %4 : vector<64x256xf32>
    %cst_5 = arith.constant 0.000000e+00 : f32
    %6 = vector.broadcast %cst_5 : f32 to vector<64x256xf32>
    %7 = arith.cmpf ogt, %5, %6 : vector<64x256xf32>
    %cst_6 = arith.constant 0.00999999977 : f32
    %8 = vector.broadcast %cst_6 : f32 to vector<64x256xf32>
    %9 = arith.mulf %8, %5 : vector<64x256xf32>
    %10 = arith.select %7, %5, %9 : vector<64x256xi1>, vector<64x256xf32>
    %c0_7 = arith.constant 0 : index
    %c0_8 = arith.constant 0 : index
    %11 = vector.load %arg4[%c0_7, %c0_8] : memref<64x64xf32, #tpu.memory_space<vmem>>, vector<64x64xf32>
    %cst_9 = arith.constant dense<0.000000e+00> : vector<64x256xf32>
    %12 = tpu.matmul %11, %10, %cst_9 {dimension_numbers = #tpu.dot_dimension_numbers<[1], [0], [0], [1], [0, 0, 1, 1], [], []>} : vector<64x64xf32>, vector<64x256xf32>, vector<64x256xf32> -> vector<64x256xf32>
    %c0_10 = arith.constant 0 : index
    %c0_11 = arith.constant 0 : index
    %13 = vector.load %arg5[%c0_10, %c0_11] : memref<64x1xf32, #tpu.memory_space<vmem>>, vector<64x1xf32>
    %14 = vector.broadcast %13 : vector<64x1xf32> to vector<64x256xf32>
    %15 = arith.addf %12, %14 : vector<64x256xf32>
    %cst_12 = arith.constant 0.000000e+00 : f32
    %16 = vector.broadcast %cst_12 : f32 to vector<64x256xf32>
    %17 = arith.cmpf ogt, %15, %16 : vector<64x256xf32>
    %cst_13 = arith.constant 0.00999999977 : f32
    %18 = vector.broadcast %cst_13 : f32 to vector<64x256xf32>
    %19 = arith.mulf %18, %15 : vector<64x256xf32>
    %20 = arith.select %17, %15, %19 : vector<64x256xi1>, vector<64x256xf32>
    %c0_14 = arith.constant 0 : index
    %c0_15 = arith.constant 0 : index
    %21 = vector.load %arg6[%c0_14, %c0_15] : memref<64x1xf32, #tpu.memory_space<vmem>>, vector<64x1xf32>
    %22 = vector.broadcast %21 : vector<64x1xf32> to vector<64x256xf32>
    %23 = arith.mulf %20, %22 : vector<64x256xf32>
    %cst_16 = arith.constant dense<0.000000e+00> : vector<256xf32>
    %24 = vector.multi_reduction <add>, %23, %cst_16 [0] : vector<64x256xf32> to vector<256xf32>
    %25 = vector.shape_cast %24 : vector<256xf32> to vector<1x256xf32>
    %c0_17 = arith.constant 0 : index
    %26 = memref.load %arg7[%c0_17] : memref<1xf32, #tpu.memory_space<smem>>
    %27 = vector.broadcast %26 : f32 to vector<1x256xf32>
    %28 = arith.addf %25, %27 : vector<1x256xf32>
    %c0_18 = arith.constant 0 : index
    %c0_19 = arith.constant 0 : index
    %c0_20 = arith.constant 0 : index
    %29 = vector.load %arg8[%c0_18, %c0_19, %c0_20] : memref<1x1x256xf32, #tpu.memory_space<vmem>>, vector<1x1x256xf32>
    %30 = vector.shape_cast %29 : vector<1x1x256xf32> to vector<1x256xf32>
    %31 = vector.shape_cast %28 : vector<1x256xf32> to vector<1x1x256xf32>
    tpu.vector_store %arg8[%c0_18, %c0_19, %c0_20], %31 {strides = array<i32>} : memref<1x1x256xf32, #tpu.memory_space<vmem>>, vector<1x1x256xf32>,
    return
  }
  func.func @transform_0(%arg0: i32) -> (i32, i32) {
    %c0_i32 = arith.constant 0 : i32
    %c0_i32_0 = arith.constant 0 : i32
    return %c0_i32, %arg0 : i32, i32
  }
  func.func @transform_1(%arg0: i32) -> (i32, i32) {
    %c0_i32 = arith.constant 0 : i32
    %c0_i32_0 = arith.constant 0 : i32
    %c0_i32_1 = arith.constant 0 : i32
    return %c0_i32, %c0_i32_0 : i32, i32
  }
  func.func @transform_2(%arg0: i32) -> (i32, i32) {
    %c0_i32 = arith.constant 0 : i32
    %c0_i32_0 = arith.constant 0 : i32
    %c0_i32_1 = arith.constant 0 : i32
    return %c0_i32, %c0_i32_0 : i32, i32
  }
  func.func @transform_3(%arg0: i32) -> (i32, i32) {
    %c0_i32 = arith.constant 0 : i32
    %c0_i32_0 = arith.constant 0 : i32
    %c0_i32_1 = arith.constant 0 : i32
    return %c0_i32, %c0_i32_0 : i32, i32
  }
  func.func @transform_4(%arg0: i32) -> (i32, i32) {
    %c0_i32 = arith.constant 0 : i32
    %c0_i32_0 = arith.constant 0 : i32
    %c0_i32_1 = arith.constant 0 : i32
    return %c0_i32, %c0_i32_0 : i32, i32
  }
  func.func @transform_5(%arg0: i32) -> (i32, i32) {
    %c0_i32 = arith.constant 0 : i32
    %c0_i32_0 = arith.constant 0 : i32
    %c0_i32_1 = arith.constant 0 : i32
    return %c0_i32, %c0_i32_0 : i32, i32
  }
  func.func @transform_6(%arg0: i32) -> i32 {
    %c0_i32 = arith.constant 0 : i32
    %c0_i32_0 = arith.constant 0 : i32
    return %c0_i32 : i32
  }
  func.func @transform_7(%arg0: i32) -> (i32, i32, i32) {
    %c0_i32 = arith.constant 0 : i32
    %c0_i32_0 = arith.constant 0 : i32
    %c0_i32_1 = arith.constant 0 : i32
    return %arg0, %c0_i32, %c0_i32_0 : i32, i32, i32
  }
}

</mosaic_0001>

<bundles_post_ra>
// kernel: critic_forward.1
= control target key start
LH: loop header
LB: loop body
LE: loop exit
PB: predicated region body
PF: predicated region fallthrough
CT: control target
= control target key end

     0   :  { %s1347_s0 = inlined_call_operand.vmem [shape: f32[32,512], index: 0, kind: input, shape index: {}]   ;;  %s1348_s1 = inlined_call_operand.vmem [shape: f32[64,32], index: 1, kind: input, shape index: {}]   ;;  %s1349_s2 = inlined_call_operand.vmem [shape: f32[64,1], index: 2, kind: input, shape index: {}]   ;;  %s1350_s3 = inlined_call_operand.vmem [shape: f32[64,64], index: 3, kind: input, shape index: {}]   ;;  %s1351_s4 = inlined_call_operand.vmem [shape: f32[64,1], index: 4, kind: input, shape index: {}]   ;;  %s1352_s5 = inlined_call_operand.vmem [shape: f32[64,1], index: 5, kind: input, shape index: {}]   ;;  %s1353_s6 = inlined_call_operand.<no memory space> [shape: f32[1], index: 6, kind: input, shape index: {}]   ;;  %s1354_s7 = inlined_call_operand.vmem [shape: f32[2,1,256], index: 7, kind: output, shape index: {}]  }
   0x1   :  { %12 = sst [smem:[#allocation2]] %s1353_s6 }
   0x2   :  { %s1141_s26 = smov 0   ;;  %s1143_s27 = smov 0  }
   0x3   :  { %s1145_s28 = smov 0  }
   0x4 LB: > { %s981_s6 = sadd.s32 4294967295, %s1093_s28   ;;  %s1158_s29 = sadd.s32 1, %s1093_s28   ;;  %s1093_s28 = sphi %s1145_s28, %s1357_s28   ;;  %s1089_s27 = sphi %s1143_s27, %s1356_s27   ;;  %s1085_s26 = sphi %s1141_s26, %s1355_s26  }
   0x5   : > { %s22_s30 = ssub.s32 %s1093_s28, %s1158_s29  ;;  %s25_s8 = sadd.s32 1, %s1089_s27 }
   0x6   : > { %p23_p0 = scmp.eq.s32.totalorder %s22_s30, 0  ;;  %p32_p1 = scmp.ne.s32.totalorder %s1089_s27, %s1085_s26 }
   0x7   : > { %p33_p2 = scmp.eq.s32.totalorder %s1093_s28, 0  ;;  %p984_p4 = scmp.ge.s32.totalorder %s1093_s28, 2 }
   0x8   : > { %s1167_s9 = scalar_select %p23_p0, %s1089_s27, %s25_s8  }
   0x9   : > { %p34_p3 = por %p33_p2, %p32_p1  ;;  %228 = sbr.rel (%p984_p4) target bundleno = 24 (0x18), region = 40 }
  0x10   : > { %231 = sbr.rel (!%p34_p3) target bundleno = 24 (0x18), region = 44  ;;  %s233_s10 = sand.u32 (%p34_p3), 1, %s1089_s27  }
  0x11   : > { %s1009_s11 = sshll.u32 (%p34_p3), %s1093_s28, 4  ;;  %s985_s12 = sshll.u32 (%p34_p3), %s233_s10, 6 }
  0x12   : > { %s238_s15 = scalar_lea.vmem (%p34_p3), %s1347_s0, %s1009_s11  ;;  %s235_s16 = scalar_lea.vmem (%p34_p3), [#allocation3], %s985_s12 }
  0x13   : > { %v251_v0 = vld [vmem:[%s238_s15] sm:$0xff] (%p34_p3)  ;;  %v253_v1 = vld [vmem:[%s238_s15 + $0x8] sm:$0xff] (%p34_p3) }
  0x14   : > { %v255_v2 = vld [vmem:[%s238_s15 + $0x20] sm:$0xff] (%p34_p3)  ;;  %252 = vst [vmem:[%s235_s16] sm:$0xff] (%p34_p3), %v251_v0  ;;  %254 = vst [vmem:[%s235_s16 + $0x8] sm:$0xff] (%p34_p3), %v253_v1  ;;  %v257_v3 = vld [vmem:[%s238_s15 + $0x28] sm:$0xff] (%p34_p3) }
  0x15   : > { %256 = vst [vmem:[%s235_s16 + $0x10] sm:$0xff] (%p34_p3), %v255_v2  ;;  %v259_v4 = vld [vmem:[%s238_s15 + $0x40] sm:$0xff] (%p34_p3)  ;;  %v261_v5 = vld [vmem:[%s238_s15 + $0x48] sm:$0xff] (%p34_p3)  ;;  %258 = vst [vmem:[%s235_s16 + $0x18] sm:$0xff] (%p34_p3), %v257_v3 }
  0x16   : > { %260 = vst [vmem:[%s235_s16 + $0x20] sm:$0xff] (%p34_p3), %v259_v4  ;;  %262 = vst [vmem:[%s235_s16 + $0x28] sm:$0xff] (%p34_p3), %v261_v5  ;;  %v263_v6 = vld [vmem:[%s238_s15 + $0x60] sm:$0xff] (%p34_p3)  ;;  %v265_v7 = vld [vmem:[%s238_s15 + $0x68] sm:$0xff] (%p34_p3) }
  0x17   : > { %264 = vst [vmem:[%s235_s16 + $0x30] sm:$0xff] %v263_v6  ;;  %266 = vst [vmem:[%s235_s16 + $0x38] sm:$0xff] %v265_v7 }
  0x18 PF: > { %p988_p5 = scmp.ge.s32.totalorder %s1093_s28, 1  ;;  %p271_p6 = scmp.lt.s32.totalorder %s1093_s28, 3 }
  0x1a   : > { %p272_p7 = pnand %p988_p5, %p271_p6 }
  0x1b   : > { %s278_s17 = sand.u32 (!%p272_p7), 1, %s1085_s26   ;;  %v1095_v8 = vmov (!%p272_p7), 0.0   ;;  %v1096_v9 = vmov (!%p272_p7), 0   ;;  %v329_v10 = vld [vmem:[%s1349_s2] sm:$0xff] (!%p272_p7)  ;;  %v330_v22 = vld [vmem:[%s1349_s2 + $0x8] sm:$0xff] (!%p272_p7)  ;;  %v331_v23 = vld [vmem:[%s1349_s2 + $0x10] sm:$0xff] (!%p272_p7) }
  0x1c   : > { %275 = sbr.rel (%p272_p7) target bundleno = 560 (0x230), region = 67  ;;  %s989_s18 = sshll.u32 (!%p272_p7), %s278_s17, 6  ;;  %466 = vmatprep.mubr.f32.mxu0 (!%p272_p7), %v1095_v8  ;;  %714 = vmatprep.mubr.f32.mxu1 (!%p272_p7), %v1095_v8  ;;  %v333_v25 = vld [vmem:[%s1349_s2 + $0x20] sm:$0xff] (!%p272_p7)  ;;  %v332_v26 = vld [vmem:[%s1349_s2 + $0x18] sm:$0xff] (!%p272_p7)  ;;  %vm377_vm0 = vcmask (!%p272_p7), 261120   ;;  %v335_v28 = vld [vmem:[%s1349_s2 + $0x30] sm:$0xff] (!%p272_p7) }
  0x1d   : > { %1069 = vset.pattern.permute.xlu0 (!%p272_p7), %v1096_v9  ;;  %1070 = vset.pattern.permute.xlu1 (!%p272_p7), %v1096_v9  ;;  %s280_s21 = scalar_lea.vmem (!%p272_p7), [#allocation3], %s989_s18  ;;  %v321_v27 = vld [vmem:[%s1348_s1] sm:$0xff] (!%p272_p7)  ;;  %v334_v29 = vld [vmem:[%s1349_s2 + $0x28] sm:$0xff] (!%p272_p7)  ;;  %v336_v32 = vld [vmem:[%s1349_s2 + $0x38] sm:$0xff] (!%p272_p7)  ;;  %s895_s24 = sld [smem:[#allocation2]] (!%p272_p7) }
  0x1e   : > { %v314_v11 = vld [vmem:[%s280_s21 + $0x8] sm:$0xff] (!%p272_p7)  ;;  %v316_v12 = vld [vmem:[%s280_s21 + $0x18] sm:$0xff] (!%p272_p7)  ;;  %v313_v13 = vld [vmem:[%s280_s21] sm:$0xff] (!%p272_p7)  ;;  %339 = vperm.xlu0 (!%p272_p7), %1069, %v329_v10   ;;  %349 = vperm.xlu1 (!%p272_p7), %1070, %v331_v23   ;;  %p309_p8 = scmp.lt.s32.totalorder (!%p272_p7), %s981_s6, 1 }
  0x1f   : > { %v1010_v14 = vpack.c.bf16 (!%p272_p7), %v316_v12, %v314_v11  ;;  %v315_v15 = vld [vmem:[%s280_s21 + $0x10] sm:$0xff] (!%p272_p7)  ;;  %v318_v16 = vld [vmem:[%s280_s21 + $0x28] sm:$0xff] (!%p272_p7)  ;;  %v320_v17 = vld [vmem:[%s280_s21 + $0x38] sm:$0xff] (!%p272_p7) }
  0x20   : > { %v1012_v18 = vpack.c.bf16 (!%p272_p7), %v315_v15, %v313_v13  ;;  %v1014_v19 = vpack.c.bf16 (!%p272_p7), %v320_v17, %v318_v16  ;;  %v317_v20 = vld [vmem:[%s280_s21 + $0x20] sm:$0xff] (!%p272_p7)  ;;  %v319_v21 = vld [vmem:[%s280_s21 + $0x30] sm:$0xff] (!%p272_p7)  ;;  %v322_v30 = vld [vmem:[%s1348_s1 + $0x8] sm:$0xff] (!%p272_p7) }
  0x21   : > { %1011 = vmatprep.subr.bf16.mxu0 (!%p272_p7), %v1010_v14  ;;  %v1016_v24 = vpack.c.bf16 (!%p272_p7), %v319_v21, %v317_v20  ;;  %v571_v31 = vld [vmem:[%s1351_s4] sm:$0xff] (!%p272_p7)  ;;  %v323_v33 = vld [vmem:[%s1348_s1 + $0x10] sm:$0xff] (!%p272_p7)  ;;  %v572_v35 = vld [vmem:[%s1351_s4 + $0x8] sm:$0xff] (!%p272_p7) }
  0x22   : > { %1013 = vmatpush1.bf16.msra.mxu0 (!%p272_p7), %v1012_v18  ;;  %344 = vperm.xlu0 (!%p272_p7), %1069, %v330_v22   ;;  %v573_v34 = vld [vmem:[%s1351_s4 + $0x10] sm:$0xff] (!%p272_p7)  ;;  %v324_v36 = vld [vmem:[%s1348_s1 + $0x18] sm:$0xff] (!%p272_p7)  ;;  %v805_v37 = vld [vmem:[%s1352_s5] sm:$0xff] (!%p272_p7) }
  0x23   : > { %1015 = vmatprep.subr.bf16.mxu0 %v1014_v19  ;;  %354 = vperm.xlu1 %1070, %v332_v26   ;;  %v574_v38 = vld [vmem:[%s1351_s4 + $0x18] sm:$0xff]  ;;  %v325_v39 = vld [vmem:[%s1348_s1 + $0x20] sm:$0xff]  ;;  %v806_v41 = vld [vmem:[%s1352_s5 + $0x8] sm:$0xff]  ;;  %s1359_s6 = smov (!%p309_p8, %s981_s6), 1 }
  0x24   : > { %v575_v40 = vld [vmem:[%s1351_s4 + $0x20] sm:$0xff]  ;;  %v326_v42 = vld [vmem:[%s1348_s1 + $0x28] sm:$0xff]  ;;  %v807_v44 = vld [vmem:[%s1352_s5 + $0x10] sm:$0xff]  ;;  %s990_s25 = sshll.u32 %s1359_s6, 1 }
  0x25   : > { %v576_v43 = vld [vmem:[%s1351_s4 + $0x28] sm:$0xff]  ;;  %v327_v45 = vld [vmem:[%s1348_s1 + $0x30] sm:$0xff]  ;;  %v808_v47 = vld [vmem:[%s1352_s5 + $0x18] sm:$0xff]  ;;  %s312_s8 = scalar_lea.vmem %s1354_s7, %s990_s25 }
  0x26   : > { %1017 = vmatpush1.bf16.msra.mxu0 %v1016_v24  ;;  %359 = vperm.xlu0 %1069, %v333_v25   ;;  %v577_v46 = vld [vmem:[%s1351_s4 + $0x30] sm:$0xff]  ;;  %v328_v48 = vld [vmem:[%s1348_s1 + $0x38] sm:$0xff]  ;;  %v809_v50 = vld [vmem:[%s1352_s5 + $0x20] sm:$0xff] }
  0x27   : > { %364 = vperm.xlu1 %1070, %v334_v29   ;;  %v578_v49 = vld [vmem:[%s1351_s4 + $0x38] sm:$0xff]  ;;  %v811_v51 = vld [vmem:[%s1352_s5 + $0x30] sm:$0xff]  ;;  %v810_v52 = vld [vmem:[%s1352_s5 + $0x28] sm:$0xff] }
  0x28   : > { %v812_v53 = vld [vmem:[%s1352_s5 + $0x38] sm:$0xff] }
  0x29   : > { %991 = vmatmul.mubr.msk.f32.vlgmr.msra.gmra.mrb[0].mxu0 %vm377_vm0, %v321_v27 }
  0x2a   : > { %472 = vmatprep.mubr.f32.mxu0 %v1095_v8  ;;  %369 = vperm.xlu0 %1069, %v335_v28  }
  0x2b   : > { %374 = vperm.xlu1 %1070, %v336_v32  }
  0x2d   : > { %992 = vmatmul.mubr.msk.f32.gmra.mrb[2].mxu0 %vm377_vm0, %v322_v30 }
  0x2e   : > { %478 = vmatprep.mubr.f32.mxu0 %v1095_v8  ;;  %581 = vperm.xlu0 %1069, %v571_v31  }
  0x2f   : > { %586 = vperm.xlu1 %1070, %v572_v35  }
  0x31   : > { %993 = vmatmul.mubr.msk.f32.gmra.mrb[4].mxu0 %vm377_vm0, %v323_v33 }
  0x32   : > { %484 = vmatprep.mubr.f32.mxu0 %v1095_v8  ;;  %591 = vperm.xlu0 %1069, %v573_v34  }
  0x33   : > { %596 = vperm.xlu1 %1070, %v574_v38  }
  0x35   : > { %994 = vmatmul.mubr.msk.f32.gmra.mrb[6].mxu0 %vm377_vm0, %v324_v36 }
  0x36   : > { %490 = vmatprep.mubr.f32.mxu0 %v1095_v8  ;;  %815 = vperm.xlu0 %1069, %v805_v37  }
  0x37   : > { %820 = vperm.xlu1 %1070, %v806_v41  }
  0x39   : > { %995 = vmatmul.mubr.msk.f32.gmra.mrb[8].mxu0 %vm377_vm0, %v325_v39 }
  0x3a   : > { %496 = vmatprep.mubr.f32.mxu0 %v1095_v8  ;;  %601 = vperm.xlu0 %1069, %v575_v40  }
  0x3b   : > { %825 = vperm.xlu1 %1070, %v807_v44  }
  0x3d   : > { %996 = vmatmul.mubr.msk.f32.gmra.mrb[10].mxu0 %vm377_vm0, %v326_v42 }
  0x3e   : > { %502 = vmatprep.mubr.f32.mxu0 %v1095_v8  ;;  %606 = vperm.xlu0 %1069, %v576_v43  }
  0x3f   : > { %830 = vperm.xlu1 %1070, %v808_v47  }
  0x41   : > { %997 = vmatmul.mubr.msk.f32.gmra.mrb[12].mxu0 %vm377_vm0, %v327_v45 }
  0x42   : > { %508 = vmatprep.mubr.f32.mxu0 %v1095_v8  ;;  %611 = vperm.xlu0 %1069, %v577_v46  }
  0x43   : > { %835 = vperm.xlu1 %1070, %v809_v50  }
  0x45   : > { %998 = vmatmul.mubr.msk.f32.gmra.mrb[14].mxu0 %vm377_vm0, %v328_v48 }
  0x46   : > { %616 = vperm.xlu0 %1069, %v578_v49   ;;  %708 = vmatprep.mubr.f32.mxu0 %v1095_v8 }
  0x47   : > { %840 = vperm.xlu1 %1070, %v810_v52  }
  0x4a   : > { %845 = vperm.xlu0 %1069, %v811_v51  }
  0x4b   : > { %850 = vperm.xlu1 %1070, %v812_v53  }
  0x9d   : > { %v340_v54 = vpop.permute.xlu0 %339  ;;  %v350_v0 = vpop.permute.xlu1 %349 }
  0xa1   : > { %v345_v59 = vpop.permute.xlu0 %344 }
  0xa2   : > { %v355_v16 = vpop.permute.xlu1 %354 }
  0xa5   : > { %v360_v24 = vpop.permute.xlu0 %359 }
  0xa6   : > { %v365_v36 = vpop.permute.xlu1 %364 }
  0xa9   : > { %v370_v44 = vpop.permute.xlu0 %369 }
  0xfc   : > { %v468_v55 = vpop.f32.mrb[0].mxu0 }
  0xfd   : > { %v469_v56 = vadd.f32 %v468_v55, %v340_v54  ;;  %v470_v57 = vpop.f32.mrb[1].mxu0 }
  0xfe   : > { %v471_v58 = vadd.f32 %v470_v57, %v340_v54 }
  0xff   : > { %v531_v61 = vmul.f32 0.01, %v469_v56  ;;  %vm515_vm1 = vcmp.gt.f32.partialorder %v469_v56, 0.0 }
 0x100   : > { %v474_v60 = vpop.f32.mrb[2].mxu0  ;;  %v532_v1 = vmul.f32 0.01, %v471_v58  ;;  %vm516_vm2 = vcmp.gt.f32.partialorder %v471_v58, 0.0 }
 0x101   : > { %v475_v62 = vadd.f32 %v474_v60, %v345_v59  ;;  %v476_v63 = vpop.f32.mrb[3].mxu0  ;;  %v547_v6 = vsel %vm515_vm1, %v469_v56, %v531_v61  ;;  %v375_v56 = vpop.permute.xlu1 %374  ;;  %vm619_vm1 = vcmask 523264  }
 0x102   : > { %v477_v2 = vadd.f32 %v476_v63, %v345_v59  ;;  %v548_v13 = vsel %vm516_vm2, %v471_v58, %v532_v1 }
 0x103   : > { %vm517_vm3 = vcmp.gt.f32.partialorder %v475_v62, 0.0  ;;  %v533_v3 = vmul.f32 0.01, %v475_v62 }
 0x104   : > { %vm518_vm4 = vcmp.gt.f32.partialorder %v477_v2, 0.0  ;;  %v534_v4 = vmul.f32 0.01, %v477_v2  ;;  %v480_v5 = vpop.f32.mrb[4].mxu0 }
 0x105   : > { %v549_v7 = vsel %vm517_vm3, %v475_v62, %v533_v3  ;;  %v481_v9 = vadd.f32 %v480_v5, %v350_v0  ;;  %v482_v10 = vpop.f32.mrb[5].mxu0 }
 0x106   : > { %v1020_v11 = vpack.c.bf16 %v549_v7, %v547_v6  ;;  %v483_v12 = vadd.f32 %v482_v10, %v350_v0  ;;  %v550_v14 = vsel %vm518_vm4, %v477_v2, %v534_v4  ;;  %v563_v7 = vld [vmem:[%s1350_s3] sm:$0xff]  ;;  %v565_v10 = vld [vmem:[%s1350_s3 + $0x10] sm:$0xff] }
 0x107   : > { %v1018_v15 = vpack.c.bf16 %v550_v14, %v548_v13  ;;  %v535_v18 = vmul.f32 0.01, %v481_v9  ;;  %vm519_vm5 = vcmp.gt.f32.partialorder %v481_v9, 0.0  ;;  %v568_v13 = vld [vmem:[%s1350_s3 + $0x28] sm:$0xff]  ;;  %v569_v14 = vld [vmem:[%s1350_s3 + $0x30] sm:$0xff] }
 0x108   : > { %v486_v17 = vpop.f32.mrb[6].mxu0  ;;  %v536_v21 = vmul.f32 0.01, %v483_v12  ;;  %vm520_vm6 = vcmp.gt.f32.partialorder %v483_v12, 0.0 }
 0x109   : > { %v487_v19 = vadd.f32 %v486_v17, %v355_v16  ;;  %v488_v20 = vpop.f32.mrb[7].mxu0  ;;  %1019 = vmatprep.subr.bf16.mxu0 %v1018_v15  ;;  %1034 = vmatprep.subr.bf16.mxu1 %v1018_v15  ;;  %v551_v27 = vsel %vm519_vm5, %v481_v9, %v535_v18  ;;  %v564_v9 = vld [vmem:[%s1350_s3 + $0x8] sm:$0xff]  ;;  %v570_v15 = vld [vmem:[%s1350_s3 + $0x38] sm:$0xff]  ;;  %v587_v17 = vpop.permute.xlu1 %586 }
 0x10a   : > { %v489_v22 = vadd.f32 %v488_v20, %v355_v16  ;;  %1021 = vmatpush1.bf16.msra.mxu0 %v1020_v11  ;;  %1038 = vmatpush1.bf16.msra.mxu1 %v1020_v11  ;;  %v552_v33 = vsel %vm520_vm6, %v483_v12, %v536_v21  ;;  %v566_v11 = vld [vmem:[%s1350_s3 + $0x18] sm:$0xff]  ;;  %v567_v12 = vld [vmem:[%s1350_s3 + $0x20] sm:$0xff]  ;;  %v582_v16 = vpop.permute.xlu0 %581 }
 0x10b   : > { %vm521_vm7 = vcmp.gt.f32.partialorder %v487_v19, 0.0  ;;  %v537_v23 = vmul.f32 0.01, %v487_v19 }
 0x10c   : > { %vm522_vm8 = vcmp.gt.f32.partialorder %v489_v22, 0.0  ;;  %v538_v25 = vmul.f32 0.01, %v489_v22  ;;  %v492_v26 = vpop.f32.mrb[8].mxu0 }
 0x10d   : > { %v553_v28 = vsel %vm521_vm7, %v487_v19, %v537_v23  ;;  %v493_v29 = vadd.f32 %v492_v26, %v360_v24  ;;  %v494_v30 = vpop.f32.mrb[9].mxu0  ;;  %v597_v19 = vpop.permute.xlu1 %596 }
 0x10e   : > { %v1024_v31 = vpack.c.bf16 %v553_v28, %v551_v27  ;;  %v495_v32 = vadd.f32 %v494_v30, %v360_v24  ;;  %v554_v34 = vsel %vm522_vm8, %v489_v22, %v538_v25  ;;  %v592_v18 = vpop.permute.xlu0 %591 }
 0x10f   : > { %v1022_v35 = vpack.c.bf16 %v554_v34, %v552_v33  ;;  %v539_v38 = vmul.f32 0.01, %v493_v29  ;;  %vm523_vm9 = vcmp.gt.f32.partialorder %v493_v29, 0.0 }
 0x110   : > { %v498_v37 = vpop.f32.mrb[10].mxu0  ;;  %v540_v41 = vmul.f32 0.01, %v495_v32  ;;  %vm524_vm10 = vcmp.gt.f32.partialorder %v495_v32, 0.0 }
 0x111   : > { %v499_v39 = vadd.f32 %v498_v37, %v365_v36  ;;  %v500_v40 = vpop.f32.mrb[11].mxu0  ;;  %1023 = vmatprep.subr.bf16.mxu0 %v1022_v35  ;;  %1035 = vmatprep.subr.bf16.mxu1 %v1022_v35  ;;  %v555_v47 = vsel %vm523_vm9, %v493_v29, %v539_v38  ;;  %v821_v21 = vpop.permute.xlu1 %820 }
 0x112   : > { %v501_v42 = vadd.f32 %v500_v40, %v365_v36  ;;  %1025 = vmatpush1.bf16.msra.mxu0 %v1024_v31  ;;  %1039 = vmatpush1.bf16.msra.mxu1 %v1024_v31  ;;  %v556_v53 = vsel %vm524_vm10, %v495_v32, %v540_v41  ;;  %v816_v20 = vpop.permute.xlu0 %815 }
 0x113   : > { %vm525_vm11 = vcmp.gt.f32.partialorder %v499_v39, 0.0  ;;  %v541_v43 = vmul.f32 0.01, %v499_v39 }
 0x114   : > { %vm526_vm12 = vcmp.gt.f32.partialorder %v501_v42, 0.0  ;;  %v542_v45 = vmul.f32 0.01, %v501_v42  ;;  %v504_v46 = vpop.f32.mrb[12].mxu0 }
 0x115   : > { %v557_v48 = vsel %vm525_vm11, %v499_v39, %v541_v43  ;;  %v505_v49 = vadd.f32 %v504_v46, %v370_v44  ;;  %v506_v50 = vpop.f32.mrb[13].mxu0  ;;  %v826_v30 = vpop.permute.xlu1 %825 }
 0x116   : > { %v1028_v51 = vpack.c.bf16 %v557_v48, %v555_v47  ;;  %v507_v52 = vadd.f32 %v506_v50, %v370_v44  ;;  %v558_v54 = vsel %vm526_vm12, %v501_v42, %v542_v45  ;;  %v602_v22 = vpop.permute.xlu0 %601 }
 0x117   : > { %v1026_v55 = vpack.c.bf16 %v558_v54, %v556_v53  ;;  %v543_v58 = vmul.f32 0.01, %v505_v49  ;;  %vm527_vm13 = vcmp.gt.f32.partialorder %v505_v49, 0.0 }
 0x118   : > { %v510_v57 = vpop.f32.mrb[14].mxu0  ;;  %v544_v61 = vmul.f32 0.01, %v507_v52  ;;  %vm528_vm14 = vcmp.gt.f32.partialorder %v507_v52, 0.0 }
 0x119   : > { %v511_v59 = vadd.f32 %v510_v57, %v375_v56  ;;  %v512_v60 = vpop.f32.mrb[15].mxu0  ;;  %1027 = vmatprep.subr.bf16.mxu0 %v1026_v55  ;;  %1036 = vmatprep.subr.bf16.mxu1 %v1026_v55  ;;  %v559_v1 = vsel %vm527_vm13, %v505_v49, %v543_v58  ;;  %v831_v50 = vpop.permute.xlu1 %830 }
 0x11a   : > { %v513_v62 = vadd.f32 %v512_v60, %v375_v56  ;;  %1029 = vmatpush1.bf16.msra.mxu0 %v1028_v51  ;;  %1040 = vmatpush1.bf16.msra.mxu1 %v1028_v51  ;;  %v560_v4 = vsel %vm528_vm14, %v507_v52, %v544_v61  ;;  %v607_v43 = vpop.permute.xlu0 %606 }
 0x11b   : > { %vm529_vm15 = vcmp.gt.f32.partialorder %v511_v59, 0.0  ;;  %v545_v63 = vmul.f32 0.01, %v511_v59 }
 0x11c   : > { %vm530_vm0 = vcmp.gt.f32.partialorder %v513_v62, 0.0  ;;  %v546_v0 = vmul.f32 0.01, %v513_v62 }
 0x11d   : > { %v561_v2 = vsel %vm529_vm15, %v511_v59, %v545_v63 }
 0x11e   : > { %v1032_v3 = vpack.c.bf16 %v561_v2, %v559_v1  ;;  %v562_v5 = vsel %vm530_vm0, %v513_v62, %v546_v0  ;;  %v612_v62 = vpop.permute.xlu0 %611 }
 0x11f   : > { %v1030_v6 = vpack.c.bf16 %v562_v5, %v560_v4 }
 0x121   : > { %1031 = vmatprep.subr.bf16.mxu0 %v1030_v6  ;;  %1037 = vmatprep.subr.bf16.mxu1 %v1030_v6  ;;  %v836_v6 = vpop.permute.xlu1 %835 }
 0x122   : > { %1033 = vmatpush1.bf16.msra.mxu0 %v1032_v3  ;;  %1041 = vmatpush1.bf16.msra.mxu1 %v1032_v3 }
 0x125   : > { %999 = vmatmul.mubr.msk.f32.vlgmr.msra.gmra.mrb[16].mxu0 %vm619_vm1, %v563_v7  ;;  %1000 = vmatmul.mubr.msk.f32.vlgmr.msra.gmra.mrb[0].mxu1 %vm619_vm1, %v564_v9 }
 0x126   : > { %720 = vmatprep.mubr.f32.mxu1 %v1095_v8 }
 0x129   : > { %1001 = vmatmul.mubr.msk.f32.gmra.mrb[2].mxu1 %vm619_vm1, %v565_v10 }
 0x12a   : > { %726 = vmatprep.mubr.f32.mxu1 %v1095_v8 }
 0x12d   : > { %1002 = vmatmul.mubr.msk.f32.gmra.mrb[4].mxu1 %vm619_vm1, %v566_v11 }
 0x12e   : > { %732 = vmatprep.mubr.f32.mxu1 %v1095_v8 }
 0x131   : > { %1003 = vmatmul.mubr.msk.f32.gmra.mrb[6].mxu1 %vm619_vm1, %v567_v12 }
 0x132   : > { %738 = vmatprep.mubr.f32.mxu1 %v1095_v8 }
 0x135   : > { %1004 = vmatmul.mubr.msk.f32.gmra.mrb[8].mxu1 %vm619_vm1, %v568_v13 }
 0x136   : > { %744 = vmatprep.mubr.f32.mxu1 %v1095_v8 }
 0x139   : > { %1005 = vmatmul.mubr.msk.f32.gmra.mrb[10].mxu1 %vm619_vm1, %v569_v14 }
 0x13a   : > { %750 = vmatprep.mubr.f32.mxu1 %v1095_v8 }
 0x13d   : > { %1006 = vmatmul.mubr.msk.f32.gmra.mrb[12].mxu1 %vm619_vm1, %v570_v15 }
 0x1f8   : > { %v710_v23 = vpop.f32.mrb[16].mxu0  ;;  %v716_v24 = vpop.f32.mrb[0].mxu1 }
 0x1f9   : > { %v711_v25 = vadd.f32 %v710_v23, %v582_v16  ;;  %v717_v26 = vadd.f32 %v716_v24, %v587_v17  ;;  %v712_v27 = vpop.f32.mrb[17].mxu0  ;;  %v718_v28 = vpop.f32.mrb[1].mxu1 }
 0x1fa   : > { %v713_v8 = vadd.f32 %v712_v27, %v582_v16  ;;  %v719_v29 = vadd.f32 %v718_v28, %v587_v17  ;;  %v617_v23 = vpop.permute.xlu0 %616  ;;  %v841_v28 = vpop.permute.xlu1 %840 }
 0x1fb   : > { %vm757_vm2 = vcmp.gt.f32.partialorder %v711_v25, 0.0  ;;  %v773_v31 = vmul.f32 0.01, %v711_v25  ;;  %vm759_vm3 = vcmp.gt.f32.partialorder %v717_v26, 0.0  ;;  %v775_v32 = vmul.f32 0.01, %v717_v26 }
 0x1fc   : > { %vm758_vm4 = vcmp.gt.f32.partialorder %v713_v8, 0.0  ;;  %v774_v33 = vmul.f32 0.01, %v713_v8  ;;  %vm760_vm5 = vcmp.gt.f32.partialorder %v719_v29, 0.0  ;;  %v776_v34 = vmul.f32 0.01, %v719_v29 }
 0x1fd   : > { %v789_v35 = vsel %vm757_vm2, %v711_v25, %v773_v31  ;;  %v791_v36 = vsel %vm759_vm3, %v717_v26, %v775_v32  ;;  %v722_v37 = vpop.f32.mrb[2].mxu1 }
 0x1fe   : > { %v853_v38 = vmul.f32 %v816_v20, %v789_v35  ;;  %v855_v39 = vmul.f32 %v821_v21, %v791_v36  ;;  %v790_v40 = vsel %vm758_vm4, %v713_v8, %v774_v33  ;;  %v792_v41 = vsel %vm760_vm5, %v719_v29, %v776_v34  ;;  %v724_v42 = vpop.f32.mrb[3].mxu1 }
 0x1ff   : > { %v854_v44 = vmul.f32 %v816_v20, %v790_v40  ;;  %v856_v45 = vmul.f32 %v821_v21, %v792_v41  ;;  %v723_v46 = vadd.f32 %v722_v37, %v592_v18  ;;  %v725_v47 = vadd.f32 %v724_v42, %v592_v18  ;;  %v846_v41 = vpop.permute.xlu0 %845 }
 0x200   : > { %v869_v48 = vadd.f32 %v855_v39, %v853_v38  ;;  %v728_v49 = vpop.f32.mrb[4].mxu1 }
 0x201   : > { %v882_v51 = vadd.f32 %v856_v45, %v854_v44  ;;  %vm761_vm6 = vcmp.gt.f32.partialorder %v723_v46, 0.0  ;;  %v777_v52 = vmul.f32 0.01, %v723_v46  ;;  %vm762_vm7 = vcmp.gt.f32.partialorder %v725_v47, 0.0  ;;  %v730_v53 = vpop.f32.mrb[5].mxu1 }
 0x202   : > { %v778_v54 = vmul.f32 0.01, %v725_v47  ;;  %v729_v55 = vadd.f32 %v728_v49, %v597_v19  ;;  %v731_v56 = vadd.f32 %v730_v53, %v597_v19  ;;  %v851_v53 = vpop.permute.xlu1 %850 }
 0x203   : > { %v793_v57 = vsel %vm761_vm6, %v723_v46, %v777_v52 }
 0x204   : > { %v857_v58 = vmul.f32 %v826_v30, %v793_v57  ;;  %v794_v59 = vsel %vm762_vm7, %v725_v47, %v778_v54  ;;  %vm763_vm8 = vcmp.gt.f32.partialorder %v729_v55, 0.0  ;;  %v779_v60 = vmul.f32 0.01, %v729_v55  ;;  %v734_v61 = vpop.f32.mrb[6].mxu1 }
 0x205   : > { %v858_v63 = vmul.f32 %v826_v30, %v794_v59  ;;  %vm764_vm9 = vcmp.gt.f32.partialorder %v731_v56, 0.0  ;;  %v780_v0 = vmul.f32 0.01, %v731_v56  ;;  %v735_v1 = vadd.f32 %v734_v61, %v602_v22  ;;  %v736_v2 = vpop.f32.mrb[7].mxu1 }
 0x206   : > { %v870_v3 = vadd.f32 %v869_v48, %v857_v58  ;;  %v795_v4 = vsel %vm763_vm8, %v729_v55, %v779_v60  ;;  %v737_v5 = vadd.f32 %v736_v2, %v602_v22 }
 0x207   : > { %v883_v7 = vadd.f32 %v882_v51, %v858_v63  ;;  %v859_v9 = vmul.f32 %v831_v50, %v795_v4  ;;  %v796_v10 = vsel %vm764_vm9, %v731_v56, %v780_v0  ;;  %vm765_vm10 = vcmp.gt.f32.partialorder %v735_v1, 0.0 }
 0x208   : > { %v860_v11 = vmul.f32 %v831_v50, %v796_v10  ;;  %v781_v12 = vmul.f32 0.01, %v735_v1  ;;  %vm766_vm11 = vcmp.gt.f32.partialorder %v737_v5, 0.0  ;;  %v782_v13 = vmul.f32 0.01, %v737_v5  ;;  %v740_v14 = vpop.f32.mrb[8].mxu1 }
 0x209   : > { %v871_v15 = vadd.f32 %v870_v3, %v859_v9  ;;  %v741_v16 = vadd.f32 %v740_v14, %v607_v43  ;;  %v742_v17 = vpop.f32.mrb[9].mxu1  ;;  %v1097_v3 = vmov 1966171168   ;;  %v896_v10 = vstv %s895_s24 }
 0x20a   : > { %v884_v18 = vadd.f32 %v883_v7, %v860_v11  ;;  %v797_v19 = vsel %vm765_vm10, %v735_v1, %v781_v12  ;;  %v798_v20 = vsel %vm766_vm11, %v737_v5, %v782_v13  ;;  %v743_v21 = vadd.f32 %v742_v17, %v607_v43 }
 0x20b   : > { %v861_v24 = vmul.f32 %v836_v6, %v797_v19  ;;  %v862_v22 = vmul.f32 %v836_v6, %v798_v20  ;;  %vm767_vm12 = vcmp.gt.f32.partialorder %v741_v16, 0.0  ;;  %v783_v25 = vmul.f32 0.01, %v741_v16 }
 0x20c   : > { %vm768_vm13 = vcmp.gt.f32.partialorder %v743_v21, 0.0  ;;  %v784_v26 = vmul.f32 0.01, %v743_v21  ;;  %v746_v27 = vpop.f32.mrb[10].mxu1  ;;  %v903_v4 = vunpack.c.l.s4 %v1097_v3  ;;  %v905_v5 = vlaneseq }
 0x20d   : > { %v872_v8 = vadd.f32 %v871_v15, %v861_v24  ;;  %v885_v29 = vadd.f32 %v884_v18, %v862_v22  ;;  %v799_v30 = vsel %vm767_vm12, %v741_v16, %v783_v25  ;;  %v747_v31 = vadd.f32 %v746_v27, %v612_v62  ;;  %v748_v32 = vpop.f32.mrb[11].mxu1 }
 0x20e   : > { %v863_v33 = vmul.f32 %v841_v28, %v799_v30  ;;  %v800_v34 = vsel %vm768_vm13, %v743_v21, %v784_v26  ;;  %v749_v35 = vadd.f32 %v748_v32, %v612_v62  ;;  %v904_v12 = vunpack.c.0.s8 %v903_v4 }
 0x20f   : > { %v864_v36 = vmul.f32 %v841_v28, %v800_v34  ;;  %vm769_vm14 = vcmp.gt.f32.partialorder %v747_v31, 0.0  ;;  %v785_v37 = vmul.f32 0.01, %v747_v31  ;;  %v906_v13 = vshrl.u32 %v905_v5, 7 }
 0x210   : > { %v873_v38 = vadd.f32 %v872_v8, %v863_v33  ;;  %vm770_vm15 = vcmp.gt.f32.partialorder %v749_v35, 0.0  ;;  %v786_v39 = vmul.f32 0.01, %v749_v35  ;;  %v752_v40 = vpop.f32.mrb[12].mxu1  ;;  %vm919_vm2 = vcmp.lt.s32.totalorder %v905_v5, 256 }
 0x211   : > { %v886_v42 = vadd.f32 %v885_v29, %v864_v36  ;;  %v801_v43 = vsel %vm769_vm14, %v747_v31, %v785_v37  ;;  %v753_v44 = vadd.f32 %v752_v40, %v617_v23  ;;  %v754_v45 = vpop.f32.mrb[13].mxu1  ;;  %v907_v18 = vsub.s32 %v904_v12, %v906_v13 }
 0x212   : > { %v865_v46 = vmul.f32 %v846_v41, %v801_v43  ;;  %v802_v47 = vsel %vm770_vm15, %v749_v35, %v786_v39  ;;  %v755_v48 = vadd.f32 %v754_v45, %v617_v23 }
 0x213   : > { %v866_v49 = vmul.f32 %v846_v41, %v802_v47  ;;  %vm771_vm0 = vcmp.gt.f32.partialorder %v753_v44, 0.0  ;;  %v787_v50 = vmul.f32 0.01, %v753_v44 }
 0x214   : > { %v874_v51 = vadd.f32 %v873_v38, %v865_v46  ;;  %vm772_vm1 = vcmp.gt.f32.partialorder %v755_v48, 0.0  ;;  %v788_v52 = vmul.f32 0.01, %v755_v48 }
 0x215   : > { %v887_v54 = vadd.f32 %v886_v42, %v866_v49  ;;  %v803_v55 = vsel %vm771_vm0, %v753_v44, %v787_v50 }
 0x216   : > { %v867_v56 = vmul.f32 %v851_v53, %v803_v55  ;;  %v804_v57 = vsel %vm772_vm1, %v755_v48, %v788_v52 }
 0x217   : > { %v868_v58 = vmul.f32 %v851_v53, %v804_v57 }
 0x218   : > { %v875_v59 = vadd.f32 %v874_v51, %v867_v56 }
 0x219   : > { %v888_v60 = vadd.f32 %v887_v54, %v868_v58 }
 0x21a   : > { %v876_v61 = vrot.slane %v875_v59, 4 }
 0x21b   : > { %v889_v62 = vrot.slane %v888_v60, 4 }
 0x21c   : > { %v877_v63 = vadd.f32 %v876_v61, %v875_v59 }
 0x21d   : > { %v890_v0 = vadd.f32 %v889_v62, %v888_v60 }
 0x21e   : > { %v878_v1 = vrot.slane %v877_v63, 2 }
 0x21f   : > { %v891_v2 = vrot.slane %v890_v0, 2 }
 0x220   : > { %v879_v6 = vadd.f32 %v878_v1, %v877_v63 }
 0x221   : > { %v892_v7 = vadd.f32 %v891_v2, %v890_v0 }
 0x222   : > { %v880_v9 = vrot.slane %v879_v6, 1 }
 0x223   : > { %v893_v11 = vrot.slane %v892_v7, 1 }
 0x224   : > { %v881_v14 = vadd.f32 %v880_v9, %v879_v6 }
 0x225   : > { %v894_v15 = vadd.f32 %v893_v11, %v892_v7 }
 0x226   : > { %v897_v16 = vadd.f32 %v896_v10, %v881_v14 }
 0x227   : > { %v898_v17 = vadd.f32 %v896_v10, %v894_v15 }
 0x229   : > { %v901_v19 = vcombine.low %v897_v16, %v898_v17 }
 0x22b   : > { %v908_v20 = vrot.slane %v901_v19, %v907_v18 }
 0x22d   : > { %v915_v21 = vrot.slane %v908_v20, %v907_v18 }
 0x22f   : > { %921 = vst.msk [vmem:[%s312_s8] sm:$0x3] %vm919_vm2, %v915_v21 }
 0x230 PF: > { %p15_p9 = scmp.ge.s32.totalorder %s1158_s29, 4   ;;  %s1355_s26 = smov %s1089_s27 }
 0x231   : > { %s1356_s27 = smov %s1167_s9  ;;  %s1357_s28 = smov %s1158_s29 }
 0x232   :  { %17 = sbr.rel (!%p15_p9) target bundleno = 4 (0x4), region = 106 }

</bundles_post_ra>
